<compile_context>
chip_gen: v6e
topology: v6e:2x2x1
jax: 0.10.0
libtpu: 0.0.40
codegen_flags: <defaults>
</compile_context>

<pallas_src>
import jax
import jax.numpy as jnp
from jax.experimental import pallas as pl
from jax.experimental.pallas import tpu as pltpu

_LANE = 128


def _round_up(x, m):
    return ((x + m - 1) // m) * m


def _vmem_capacity_bytes():
    try:
        return int(pltpu.get_tpu_info().vmem_capacity_bytes)
    except Exception:
        return 64 << 20  # conservative fallback (v7x per-TC VMEM)


def _cnn_kernel(x_ref, wc_ref, bc_ref, w12_ref, b12_ref, o_ref):
    # x_ref:   (TB, C_in)          bf16 batch tile (L=1 squeezed in the wrapper)
    # wc_ref:  (C_in, HID_PAD)     bf16 conv1d(k=1) weight, pre-transposed, resident
    # bc_ref:  (1, HID_PAD)        f32 conv bias (zero-padded)
    # w12_ref: (HID_PAD, OUT_PAD)  bf16 folded Linear(hidden,10)@Linear(10,out)
    # b12_ref: (1, OUT_PAD)        f32 folded bias (zero-padded)
    # o_ref:   (TB, OUT_PAD)       bf16 lane-dense output tile
    h = jnp.dot(x_ref[...], wc_ref[...], preferred_element_type=jnp.float32)
    h = jnp.maximum(h + bc_ref[...], 0.0)           # bias + ReLU in f32 on the VPU
    h = h.astype(jnp.bfloat16)                      # feed the second MXU matmul in bf16
    o = jnp.dot(h, w12_ref[...], preferred_element_type=jnp.float32) + b12_ref[...]
    o_ref[...] = o.astype(o_ref.dtype)


def init_params(key, input_size, hidden_dim, output_size):
    """Deterministic init mimicking PyTorch's default U(-1/sqrt(fan_in), +...)."""
    ks = jax.random.split(key, 6)

    def unif(k, shape, fan_in):
        bound = 1.0 / (fan_in ** 0.5)
        return jax.random.uniform(k, shape, jnp.float32, -bound, bound)

    # Conv1d(in=input_size, out=hidden_dim, k=1): stored pre-transposed.
    wc = unif(ks[0], (input_size, hidden_dim), input_size)
    bc = unif(ks[1], (1, hidden_dim), input_size)
    # Linear(hidden_dim, 10): stored pre-transposed (hidden, 10).
    w1 = unif(ks[2], (hidden_dim, 10), hidden_dim)
    b1 = unif(ks[3], (1, 10), hidden_dim)
    # Linear(10, output_size): stored pre-transposed (10, out).
    w2 = unif(ks[4], (10, output_size), 10)
    b2 = unif(ks[5], (1, output_size), 10)
    return (wc, bc, w1, b1, w2, b2)


def prepare_params(raw_params):
    """Fold the two Linears, lane-pad hidden & out to 128, cast weights to bf16."""
    wc, bc, w1, b1, w2, b2 = raw_params
    hidden = wc.shape[1]
    out_dim = w2.shape[1]
    hid_pad = _round_up(hidden, _LANE)
    out_pad = _round_up(out_dim, _LANE)

    # Exact composition of the two affine maps (no nonlinearity between them).
    w12 = w1 @ w2                # (hidden, out)
    b12 = b1 @ w2 + b2           # (1, out)

    # Zero padding is numerically exact: relu(x@0 + 0) = 0 in the padded hidden
    # columns and the corresponding w12 rows are zero.
    wc_p = jnp.pad(wc, ((0, 0), (0, hid_pad - hidden))).astype(jnp.bfloat16)
    bc_p = jnp.pad(bc, ((0, 0), (0, hid_pad - hidden))).astype(jnp.float32)
    w12_p = jnp.pad(w12, ((0, hid_pad - hidden), (0, out_pad - out_dim))).astype(jnp.bfloat16)
    b12_p = jnp.pad(b12, ((0, 0), (0, out_pad - out_dim))).astype(jnp.float32)
    return (wc_p, bc_p, w12_p, b12_p), out_dim


def _choose_tb(batch, block_batch):
    """Batch-tile size: >=8 sublane aligned; >=2 grid blocks when batch allows."""
    if batch <= 16:
        return _round_up(batch, 8)          # single small block, 8-aligned sublanes
    # At least 2 grid steps so ("parallel",) can shard the batch across both
    # TensorCores on v7x; harmless on the 1-TC v5e/v6e.
    tb = min(block_batch, _round_up(pl.cdiv(batch, 2), 16))
    return max(_round_up(tb, 8), 8)


def _vmem_estimate(tb, c_in, hid_pad, out_pad):
    return (
        2 * (2 * tb * c_in)                 # x tile (bf16), double-buffered
        + 2 * (2 * tb * out_pad)            # out tile (bf16), double-buffered
        + 2 * (4 * tb * hid_pad)            # intermediate h (f32), generous 2x
        + 2 * (2 * c_in * hid_pad + 4 * hid_pad
               + 2 * hid_pad * out_pad + 4 * out_pad)   # resident weights/biases
        + (2 << 20)                         # compiler scratch / headroom
    )


def cnn_forward(x_ncl, packed_params, out_dim, *, block_batch=None):
    """x_ncl: (batch, input_size, 1) float32, NCL like the PyTorch module."""
    assert x_ncl.shape[-1] == 1, "Flatten -> Linear(hidden_dim, 10) requires L == 1"
    # TODO(synk): the conv-as-matmul + flatten mapping is only valid for L == 1.
    wc, bc, w12, b12 = packed_params
    x = x_ncl[..., 0].astype(jnp.bfloat16)          # (N, C_in), bf16 halves the x stream
    batch, c_in = x.shape
    hid_pad = wc.shape[1]
    out_pad = w12.shape[1]

    vmem_phys = _vmem_capacity_bytes()
    vmem_cap = int(0.75 * vmem_phys)                # ~48 MiB v7x, ~96 MiB v5e/v6e
    if block_batch is None:
        block_batch = 1024 if vmem_phys >= (96 << 20) else 512

    tb = _choose_tb(batch, block_batch)
    while _vmem_estimate(tb, c_in, hid_pad, out_pad) > vmem_cap and tb > 16:
        tb = max(16, _round_up(tb // 2, 8))

    # Partial last block handled by Pallas (boundary DMAs are clipped), so no
    # wrapper-side jnp.pad / extra HBM pass over x is needed.
    n_blocks = pl.cdiv(batch, tb)

    flops = 2 * batch * (c_in * hid_pad + hid_pad * out_pad)
    bytes_accessed = (
        2 * batch * c_in
        + 2 * c_in * hid_pad + 4 * hid_pad
        + 2 * hid_pad * out_pad + 4 * out_pad
        + 2 * batch * out_pad
    )
    est = _vmem_estimate(tb, c_in, hid_pad, out_pad)
    vmem_limit = int(min(max(est, 16 << 20), vmem_cap))

    out = pl.pallas_call(
        _cnn_kernel,
        out_shape=jax.ShapeDtypeStruct((batch, out_pad), jnp.bfloat16),
        grid=(n_blocks,),
        in_specs=[
            pl.BlockSpec((tb, c_in), lambda i: (i, 0)),          # x: tiled over batch
            pl.BlockSpec((c_in, hid_pad), lambda i: (0, 0)),     # weights resident
            pl.BlockSpec((1, hid_pad), lambda i: (0, 0)),
            pl.BlockSpec((hid_pad, out_pad), lambda i: (0, 0)),
            pl.BlockSpec((1, out_pad), lambda i: (0, 0)),
        ],
        out_specs=pl.BlockSpec((tb, out_pad), lambda i: (i, 0)),
        compiler_params=pltpu.CompilerParams(
            dimension_semantics=("parallel",),   # shards batch blocks over 2 TCs on v7x
            vmem_limit_bytes=vmem_limit,
        ),
        cost_estimate=pl.CostEstimate(
            flops=flops, transcendentals=0, bytes_accessed=bytes_accessed
        ),
    )(x, wc, bc, w12, b12)

    return out[:, :out_dim].astype(jnp.float32)


def _reference(x_ncl, raw_params):
    """Pure-JAX f32 reference matching the original (unfused) PyTorch forward."""
    wc, bc, w1, b1, w2, b2 = raw_params
    xf = x_ncl[..., 0]
    h = jnp.maximum(xf @ wc + bc, 0.0)
    return (h @ w1 + b1) @ w2 + b2


if __name__ == "__main__":
    key = jax.random.PRNGKey(0)
    batch, input_size, hidden_dim, output_size = 2, 4, 32, 1

    k_x, k_p = jax.random.split(key)
    x = jax.random.normal(k_x, (batch, input_size, 1), jnp.float32)  # NCL, L=1
    raw_params = init_params(k_p, input_size, hidden_dim, output_size)
    packed_params, out_dim = prepare_params(raw_params)

    out = cnn_forward(x, packed_params, out_dim)
    jax.block_until_ready(out)
    ref = _reference(x, raw_params)
    assert out.shape == (batch, output_size)
    # bf16 streaming of x / weights / output -> compare to the f32 reference
    # with a bf16-appropriate tolerance.
    assert jnp.allclose(out, ref, atol=5e-2, rtol=5e-2)

    # Tiled path with a partial last block (3 grid steps, no wrapper padding).
    batch2 = 20
    x2 = jax.random.normal(jax.random.PRNGKey(1), (batch2, input_size, 1), jnp.float32)
    out2 = cnn_forward(x2, packed_params, out_dim, block_batch=8)
    jax.block_until_ready(out2)
    ref2 = _reference(x2, raw_params)
    assert out2.shape == (batch2, output_size)
    assert jnp.allclose(out2, ref2, atol=5e-2, rtol=5e-2)

    # Default block_batch path: batch split into >=2 blocks (both TCs on v7x),
    # uneven tail exercised.
    batch3 = 50
    x3 = jax.random.normal(jax.random.PRNGKey(2), (batch3, input_size, 1), jnp.float32)
    out3 = cnn_forward(x3, packed_params, out_dim)
    jax.block_until_ready(out3)
    ref3 = _reference(x3, raw_params)
    assert out3.shape == (batch3, output_size)
    assert jnp.allclose(out3, ref3, atol=5e-2, rtol=5e-2)

    print("KERNEL_OK")
</pallas_src>

<mosaic_0001>
module attributes {stable_mosaic.version = 11 : i64} {
  func.func @_cnn_kernel(%arg0: i32, %arg1: memref<8x4xbf16, #tpu.memory_space<vmem>>, %arg2: memref<4x128xbf16, #tpu.memory_space<vmem>>, %arg3: memref<1x128xf32, #tpu.memory_space<vmem>>, %arg4: memref<128x128xbf16, #tpu.memory_space<vmem>>, %arg5: memref<1x128xf32, #tpu.memory_space<vmem>>, %arg6: memref<8x128xbf16, #tpu.memory_space<vmem>>) attributes {dimension_semantics = [#tpu.dimension_semantics<parallel>], iteration_bounds = array<i64: 1>, scalar_prefetch = 0 : i64, scratch_operands = 0 : i64, tpu.core_type = #tpu.core_type<tc>, window_params = [{transform_indices = @transform_0, window_bounds = array<i64: 8, 4>}, {pipeline_mode = #tpu.pipeline_mode<synchronous>, transform_indices = @transform_1, window_bounds = array<i64: 4, 128>}, {pipeline_mode = #tpu.pipeline_mode<synchronous>, transform_indices = @transform_2, window_bounds = array<i64: 1, 128>}, {pipeline_mode = #tpu.pipeline_mode<synchronous>, transform_indices = @transform_3, window_bounds = array<i64: 128, 128>}, {pipeline_mode = #tpu.pipeline_mode<synchronous>, transform_indices = @transform_4, window_bounds = array<i64: 1, 128>}, {transform_indices = @transform_5, window_bounds = array<i64: 8, 128>}]} {
    %c0 = arith.constant 0 : index
    %c0_0 = arith.constant 0 : index
    %0 = vector.load %arg1[%c0, %c0_0] : memref<8x4xbf16, #tpu.memory_space<vmem>>, vector<8x4xbf16>
    %c0_1 = arith.constant 0 : index
    %c0_2 = arith.constant 0 : index
    %1 = vector.load %arg2[%c0_1, %c0_2] : memref<4x128xbf16, #tpu.memory_space<vmem>>, vector<4x128xbf16>
    %cst = arith.constant dense<0.000000e+00> : vector<8x128xf32>
    %2 = tpu.matmul %0, %1, %cst {dimension_numbers = #tpu.dot_dimension_numbers<[1], [0], [0], [1], [0, 0, 1, 1], [], []>} : vector<8x4xbf16>, vector<4x128xbf16>, vector<8x128xf32> -> vector<8x128xf32>
    %c0_3 = arith.constant 0 : index
    %c0_4 = arith.constant 0 : index
    %3 = vector.load %arg3[%c0_3, %c0_4] : memref<1x128xf32, #tpu.memory_space<vmem>>, vector<1x128xf32>
    %4 = vector.broadcast %3 : vector<1x128xf32> to vector<8x128xf32>
    %5 = arith.addf %2, %4 : vector<8x128xf32>
    %cst_5 = arith.constant 0.000000e+00 : f32
    %6 = vector.broadcast %cst_5 : f32 to vector<8x128xf32>
    %7 = arith.maximumf %5, %6 : vector<8x128xf32>
    %8 = arith.truncf %7 : vector<8x128xf32> to vector<8x128xbf16>
    %c0_6 = arith.constant 0 : index
    %c0_7 = arith.constant 0 : index
    %9 = vector.load %arg4[%c0_6, %c0_7] : memref<128x128xbf16, #tpu.memory_space<vmem>>, vector<128x128xbf16>
    %cst_8 = arith.constant dense<0.000000e+00> : vector<8x128xf32>
    %10 = tpu.matmul %8, %9, %cst_8 {dimension_numbers = #tpu.dot_dimension_numbers<[1], [0], [0], [1], [0, 0, 1, 1], [], []>} : vector<8x128xbf16>, vector<128x128xbf16>, vector<8x128xf32> -> vector<8x128xf32>
    %c0_9 = arith.constant 0 : index
    %c0_10 = arith.constant 0 : index
    %11 = vector.load %arg5[%c0_9, %c0_10] : memref<1x128xf32, #tpu.memory_space<vmem>>, vector<1x128xf32>
    %12 = vector.broadcast %11 : vector<1x128xf32> to vector<8x128xf32>
    %13 = arith.addf %10, %12 : vector<8x128xf32>
    %14 = arith.truncf %13 : vector<8x128xf32> to vector<8x128xbf16>
    %c0_11 = arith.constant 0 : index
    %c0_12 = arith.constant 0 : index
    %15 = vector.load %arg6[%c0_11, %c0_12] : memref<8x128xbf16, #tpu.memory_space<vmem>>, vector<8x128xbf16>
    tpu.vector_store %arg6[%c0_11, %c0_12], %14 {strides = array<i32>} : memref<8x128xbf16, #tpu.memory_space<vmem>>, vector<8x128xbf16>,
    return
  }
  func.func @transform_0(%arg0: i32) -> (i32, i32) {
    %c0_i32 = arith.constant 0 : i32
    %c0_i32_0 = arith.constant 0 : i32
    return %arg0, %c0_i32 : i32, i32
  }
  func.func @transform_1(%arg0: i32) -> (i32, i32) {
    %c0_i32 = arith.constant 0 : i32
    %c0_i32_0 = arith.constant 0 : i32
    %c0_i32_1 = arith.constant 0 : i32
    return %c0_i32, %c0_i32_0 : i32, i32
  }
  func.func @transform_2(%arg0: i32) -> (i32, i32) {
    %c0_i32 = arith.constant 0 : i32
    %c0_i32_0 = arith.constant 0 : i32
    %c0_i32_1 = arith.constant 0 : i32
    return %c0_i32, %c0_i32_0 : i32, i32
  }
  func.func @transform_3(%arg0: i32) -> (i32, i32) {
    %c0_i32 = arith.constant 0 : i32
    %c0_i32_0 = arith.constant 0 : i32
    %c0_i32_1 = arith.constant 0 : i32
    return %c0_i32, %c0_i32_0 : i32, i32
  }
  func.func @transform_4(%arg0: i32) -> (i32, i32) {
    %c0_i32 = arith.constant 0 : i32
    %c0_i32_0 = arith.constant 0 : i32
    %c0_i32_1 = arith.constant 0 : i32
    return %c0_i32, %c0_i32_0 : i32, i32
  }
  func.func @transform_5(%arg0: i32) -> (i32, i32) {
    %c0_i32 = arith.constant 0 : i32
    %c0_i32_0 = arith.constant 0 : i32
    return %arg0, %c0_i32 : i32, i32
  }
}

</mosaic_0001>

<bundles_post_ra>
// kernel: tpu_custom_call.1
= control target key start
LH: loop header
LB: loop body
LE: loop exit
PB: predicated region body
PF: predicated region fallthrough
CT: control target
= control target key end

     0   :  { %10 = vsyncpa [#allocation3], 0  ;;  %s534_s0 = inlined_call_operand.hbm [shape: bf16[2,4], index: 0, kind: input, shape index: {}]   ;;  %s535_s1 = inlined_call_operand.hbm [shape: bf16[4,128], index: 1, kind: input, shape index: {}]   ;;  %s536_s2 = inlined_call_operand.vmem [shape: f32[1,128], index: 2, kind: input, shape index: {}]   ;;  %s537_s3 = inlined_call_operand.hbm [shape: bf16[128,128], index: 3, kind: input, shape index: {}]   ;;  %s538_s4 = inlined_call_operand.vmem [shape: f32[1,128], index: 4, kind: input, shape index: {}]   ;;  %s539_s5 = inlined_call_operand.hbm [shape: bf16[2,128], index: 5, kind: output, shape index: {}]  }
   0x1   :  { %11 = vsyncpa [#allocation6], 0 }
   0x2   :  { %12 = vsyncpa [#allocation4], 0 }
   0x3   :  { %17 = vsyncadd [#allocation3], 48  ;;  %s469_s18 = smov [#allocation5]   ;;  %s470_s20 = smov [#allocation2]  }
   0x4   :  { %s31_s19 = sshll.u32 %s469_s18, 4  ;;  %s18_s21 = sshll.u32 %s470_s20, 4  ;;  %s32_s19 = int_to_ptr.vmem [resolvable:$true] %s31_s19  ;;  %s19_s21 = int_to_ptr.vmem [resolvable:$true] %s18_s21 }
   0x5   :  { %s391_s22 = scalar_lea.vmem %s32_s19, 32  ;;  %p396_p1 = scmp.lt.s32.totalorder %s32_s19, %s32_s19 }
   0x6   :  { %p392_p0 = scmp.ne.s32.totalorder %s32_s19, %s391_s22  ;;  %p397_p2 = scmp.lt.s32.totalorder %s391_s22, %s391_s22 }
   0x8   :  { %p398_p3 = por %p397_p2, %p396_p1 }
   0xa   :  { %p399_p4 = pnand %p398_p3, %p392_p0 }
   0xc   :  { %402 = shalt.err (!%p399_p4)
}
   0xd   :  { %34 = dma.hbm_to_vmem [thread:$0]  %s535_s1, 32, %s32_s19, [#allocation6]  }
   0xe   :  { %s411_s25 = scalar_lea.vmem %s19_s21, 16  ;;  %s415_s26 = scalar_lea.vmem %s19_s21, 64 }
   0xf   :  { %p412_p5 = scmp.ne.s32.totalorder %s19_s21, %s411_s25  ;;  %p416_p6 = scmp.lt.s32.totalorder %s19_s21, %s19_s21 }
  0x10   :  { %p417_p7 = scmp.lt.s32.totalorder %s415_s26, %s411_s25 }
  0x12   :  { %p418_p8 = por %p417_p7, %p416_p6 }
  0x14   :  { %p419_p9 = pnand %p418_p8, %p412_p5 }
  0x16   :  { %422 = shalt.err (!%p419_p9)
}
  0x17   :  { %s471_s27 = smov 16   ;;  %s472_s28 = smov 1  }
  0x18   :  { %24 = dma.hbm_to_vmem [thread:$0]  %s534_s0, 16, %s19_s21, [#allocation3], %s471_s27, %s471_s27, %s472_s28  }
  0x19   :  { %s473_s6 = smov [#allocation7]  }
  0x1a   :  { %s42_s7 = sshll.u32 %s473_s6, 4  ;;  %s43_s7 = int_to_ptr.vmem [resolvable:$true] %s42_s7 }
  0x1b   :  { %s431_s1 = scalar_lea.vmem %s43_s7, 1024  ;;  %p436_p11 = scmp.lt.s32.totalorder %s43_s7, %s43_s7 }
  0x1c   :  { %p432_p10 = scmp.ne.s32.totalorder %s43_s7, %s431_s1  ;;  %p437_p12 = scmp.lt.s32.totalorder %s431_s1, %s431_s1 }
  0x1e   :  { %p438_p13 = por %p437_p12, %p436_p11 }
  0x20   :  { %p439_p0 = pnand %p438_p13, %p432_p10 }
  0x22   :  { %442 = shalt.err (!%p439_p0)
}
  0x23   :  { %s474_s8 = smov 64   ;;  %s475_s9 = smov 4  }
  0x24   :  { %48 = dma.hbm_to_vmem [thread:$0]  %s537_s3, 1024, %s43_s7, [#allocation6], %s474_s8, %s474_s8, %s475_s9  }
  0x25   :  { %463 = dma.done.wait [#allocation3], 64  }
  0x26   :  { %464 = vsyncadd [#allocation3], 4294967232 }
  0x27   :  { %465 = dma.done.wait [#allocation6], 1056  }
  0x28   :  { %466 = vsyncadd [#allocation6], 4294966240  ;;  %v82_v0 = vlaneseq  ;;  %v476_v1 = vmov 0.0   ;;  %vm477_vm0 = vmmov 0   ;;  %v478_v2 = vmov 1966171168  }
  0x29   :  { %338 = vmatprep.subr.bf16.mxu0 %v476_v1  ;;  %340 = vmatprep.mubr.msk.bf16.mxu0 %vm477_vm0, %v476_v1  ;;  %v80_v3 = vunpack.c.l.s4 %v478_v2  ;;  %vm105_vm1 = vcmask 1041408   ;;  %v65_v7 = vld [vmem:[#allocation5] sm:$0x3]  ;;  %v61_v8 = vld [vmem:[#allocation2] sm:$0x1]  ;;  %v376_v17 = vld [vmem:[#allocation7 + $0x30] sm:$0xff]  }
  0x2a   :  { %v83_v4 = vshrl.u32 %v82_v0, 7  ;;  %344 = vmatprep.subr.bf16.mxu1 %v476_v1  ;;  %360 = vmatprep.mubr.msk.bf16.mxu1 %vm477_vm0, %v476_v1  ;;  %v62_v9 = vld [vmem:[#allocation2 + $0x1] sm:$0x1]  ;;  %v107_v10 = vsel %vm105_vm1, %v65_v7, 0  ;;  %v63_v11 = vld [vmem:[#allocation2 + $0x2] sm:$0x1] }
  0x2b   :  { %v81_v5 = vunpack.c.0.s8 %v80_v3  ;;  %v64_v12 = vld [vmem:[#allocation2 + $0x3] sm:$0x1]  ;;  %v77_v13 = vcombine.low %v61_v8, %v62_v9  ;;  %339 = vmatpush3.bf16.msra.mxu0 %v107_v10  ;;  %vm101_vm2 = vcmask 31744   ;;  %v377_v20 = vld [vmem:[#allocation7 + $0x28] sm:$0xff]   ;;  %v378_v22 = vld [vmem:[#allocation7 + $0x20] sm:$0xff]  }
  0x2c   :  { %v375_v14 = vld [vmem:[#allocation7 + $0x38] sm:$0xff]   ;;  %v78_v15 = vcombine.low %v63_v11, %v64_v12  ;;  %v380_v24 = vld [vmem:[#allocation7 + $0x10] sm:$0xff]   ;;  %v381_v25 = vld [vmem:[#allocation7 + $0x8] sm:$0xff]  }
  0x2d   :  { %v84_v6 = vsub.s32 %v81_v5, %v83_v4  ;;  %345 = vmatpush3.bf16.msra.mxu1 %v375_v14  ;;  %v379_v23 = vld [vmem:[#allocation7 + $0x18] sm:$0xff]   ;;  %v382_v26 = vld [vmem:[#allocation7] sm:$0xff]  }
  0x2e   :  { %346 = vmatprep.subr.bf16.mxu1 %v476_v1  ;;  %v314_v27 = vld [vmem:[%s536_s2] ss:$0 sm:$0xff] }
  0x2f   :  { %v85_v16 = vrot.slane %v77_v13, %v84_v6  ;;  %v92_v18 = vrot.slane %v78_v15, %v84_v6  ;;  %v316_v35 = vld [vmem:[%s538_s4] ss:$0 sm:$0xff] }
  0x31   :  { %v93_v19 = vcombine.low %v85_v16, %v92_v18  ;;  %347 = vmatpush3.bf16.msra.mxu1 %v376_v17 }
  0x32   :  { %348 = vmatprep.subr.bf16.mxu1 %v476_v1 }
  0x33   :  { %v100_v21 = vrot.slane %v93_v19, %v84_v6 }
  0x35   :  { %341 = vmatmul.mubr.msk.bf16.vlgmr.msra.gmra.mxu0 %vm101_vm2, %v100_v21  ;;  %349 = vmatpush3.bf16.msra.mxu1 %v377_v20 }
  0x36   :  { %350 = vmatprep.subr.bf16.mxu1 %v476_v1 }
  0x39   :  { %351 = vmatpush3.bf16.msra.mxu1 %v378_v22 }
  0x3a   :  { %352 = vmatprep.subr.bf16.mxu1 %v476_v1 }
  0x3d   :  { %353 = vmatpush3.bf16.msra.mxu1 %v379_v23 }
  0x3e   :  { %354 = vmatprep.subr.bf16.mxu1 %v476_v1 }
  0x41   :  { %355 = vmatpush3.bf16.msra.mxu1 %v380_v24 }
  0x42   :  { %356 = vmatprep.subr.bf16.mxu1 %v476_v1 }
  0x45   :  { %357 = vmatpush3.bf16.msra.mxu1 %v381_v25 }
  0x46   :  { %358 = vmatprep.subr.bf16.mxu1 %v476_v1 }
  0x49   :  { %359 = vmatpush3.bf16.msra.mxu1 %v382_v26 }
  0xf5   :  { %v143_v28 = vpop.f32.mrf.mxu0 }
  0xf6   :  { %v144_v29 = vadd.f32 %v314_v27, %v143_v28 }
  0xf7   :  { %v342_v30 = vpop.f32.mrf.mxu0 }
  0xf8   :  { %v149_v31 = vmax.f32 %v144_v29, 0.0 }
  0xf9   :  { %v146_v32 = vpop.f32.mrf.mxu0 }
  0xfa   :  { %v150_v33 = vpack.c.bf16 %v149_v31, %v149_v31 }
  0xfb   :  { %v343_v34 = vpop.f32.mrf.mxu0 }
  0xfc   :  { %361 = vmatmul.mubr.bf16.vlgmr.msra.gmra.mxu1 %v150_v33 }
 0x1bc   :  { %v256_v36 = vpop.f32.mrf.mxu1 }
 0x1bd   :  { %v257_v37 = vadd.f32 %v316_v35, %v256_v36 }
 0x1be   :  { %v362_v38 = vpop.f32.mrf.mxu1 }
 0x1bf   :  { %v262_v39 = vpack.c.bf16 %v257_v37, %v257_v37 }
 0x1c0   :  { %v259_v40 = vpop.f32.mrf.mxu1 }
 0x1c1   :  { %v270_v41 = vrot.slane %v262_v39, %v84_v6 }
 0x1c2   :  { %v363_v42 = vpop.f32.mrf.mxu1 }
 0x1c3   :  { %v271_v43 = vcombine.high %v270_v41, %v270_v41  ;;  %v278_v44 = vrot.slane %v270_v41, %v84_v6  ;;  %325 = vst.sshfl [vmem:[#allocation8] sm:$0x1 pattern:$0x73625140] %v270_v41 }
 0x1c5   :  { %v285_v45 = vrot.slane %v271_v43, %v84_v6  ;;  %v286_v46 = vcombine.high %v278_v44, %v278_v44  ;;  %326 = vst.sshfl [vmem:[#allocation8 + $0x1] sm:$0x1 pattern:$0x73625140] %v271_v43 }
 0x1c7   :  { %v287_v47 = vcombine.high %v285_v45, %v285_v45  ;;  %294 = vst [vmem:[#allocation8 + $0x2] sm:$0x1] %v286_v46 }
 0x1c9   :  { %295 = vst [vmem:[#allocation8 + $0x3] sm:$0x1] %v287_v47 }
 0x1ca   :  { %300 = vsyncadd [#allocation4], 48  ;;  %s479_s2 = smov [#allocation8]  }
 0x1cb   :  { %s301_s14 = sshll.u32 %s479_s2, 4  ;;  %s302_s14 = int_to_ptr.vmem [resolvable:$true] %s301_s14 }
 0x1cc   :  { %s443_s4 = scalar_lea.vmem %s302_s14, 16  ;;  %s447_s15 = scalar_lea.vmem %s302_s14, 64 }
 0x1cd   :  { %p444_p1 = scmp.ne.s32.totalorder %s302_s14, %s443_s4  ;;  %p448_p2 = scmp.lt.s32.totalorder %s302_s14, %s302_s14 }
 0x1ce   :  { %p449_p3 = scmp.lt.s32.totalorder %s447_s15, %s443_s4 }
 0x1d0   :  { %p450_p4 = por %p449_p3, %p448_p2 }
 0x1d2   :  { %p451_p5 = pnand %p450_p4, %p444_p1 }
 0x1d4   :  { %454 = shalt.err (!%p451_p5)
}
 0x1d5   :  { %307 = dma.vmem_to_hbm [thread:$0]  %s302_s14, 16, %s539_s5, [#allocation4], %s471_s27, %s471_s27, %s472_s28  }
 0x1d6   :  { %467 = dma.done.wait [#allocation4], 64  }
 0x1d7   :  { %468 = vsyncadd [#allocation4], 4294967232 }
 0x1d8   :  { %311 = vsyncpa [#allocation3], 1 }
 0x1d9   :  { %312 = vsyncpa [#allocation6], 1 }
 0x1da   :  { %313 = vsyncpa [#allocation4], 1 }

</bundles_post_ra>
